<compile_context>
chip_gen: v7x
topology: tpu7x:2x2x1
jax: 0.10.0
libtpu: 0.0.40
codegen_flags: <defaults>
</compile_context>

<pallas_src>
import functools

import jax
import jax.numpy as jnp
import numpy as np
from jax.experimental import pallas as pl
from jax.experimental.pallas import tpu as pltpu


def _round_up(v, m):
    return ((v + m - 1) // m) * m


def _vmem_capacity_bytes():
    """Per-core VMEM capacity; conservative fallback if the query is unavailable."""
    try:
        cap = int(pltpu.get_tpu_info().vmem_capacity_bytes)
        if cap > 0:
            return cap
    except Exception:
        pass
    return 64 * 1024 * 1024  # true on v7x, a safe lower bound on v5e/v6e


def _sine_layer_kernel(x_ref, w_ref, b_ref, o_ref, *, compute_dtype):
    # x_ref: (tm, K) native dtype   w_ref: (K, N) compute_dtype
    # b_ref: (1, N)  float32        o_ref: (tm, N) out dtype
    x = x_ref[...].astype(compute_dtype)   # in-kernel cast, hidden under the MXU
    y = jnp.dot(x, w_ref[...], preferred_element_type=jnp.float32)
    # jnp.sin has no EUP path -> VPU polynomial in f32 (accurate); add bias in f32.
    o_ref[...] = jnp.sin(y + b_ref[...]).astype(o_ref.dtype)


def prepare_sine_layer_params(weight, bias, omega_0=30.0,
                              compute_dtype=jnp.bfloat16):
    """One-time param transform (hoist out of the hot path).

    weight: (out_features, in_features), bias: (out_features,)
    Returns:
      w_t : (in_features, out_features) compute_dtype, omega_0 folded in
      b2d : (1, out_features) float32, omega_0 folded in
    """
    out_features, _ = weight.shape
    w_t = (jnp.float32(omega_0) * weight.astype(jnp.float32)).T.astype(compute_dtype)
    b2d = (jnp.float32(omega_0) * bias.astype(jnp.float32)).reshape(1, out_features)
    return w_t, b2d


def _pick_tm(M, K, N, x_itemsize, out_itemsize, compute_itemsize,
             vmem_budget, target):
    """Largest row tile fitting the VMEM budget; >= 4 grid steps; multiple of 16."""
    # Resident (constant-index) operands: weight + bias. BlockSpec still
    # double-buffers them, so count them twice (see Buffered(1) TODO above).
    fixed = 2 * (K * N * compute_itemsize + N * 4)
    # Per row: double-buffered x tile + output tile, plus the in-kernel
    # compute_dtype copy of x and the f32 accumulator/sin intermediate.
    per_row = 2 * (K * x_itemsize + N * out_itemsize) + K * compute_itemsize + N * 4
    tm = max(16, int(target))
    while tm > 16 and fixed + tm * per_row > vmem_budget:
        tm //= 2
    # >= 4 grid steps (>= 2 per TensorCore on v7x) so each core can overlap the
    # x-tile DMA / output write-back with compute.
    tm = min(tm, _round_up(pl.cdiv(M, 4), 16))
    # Multiple of 16 keeps bf16 rows sublane-packed (unmasked vector ld/st).
    tm = max(16, min(_round_up(M, 16), _round_up(tm, 16)))
    return int(tm)


def sine_layer_apply(x, w_t, b2d, *, tm_target=1024,
                     compute_dtype=jnp.bfloat16, out_dtype=None):
    """x: (..., in_features). w_t/b2d from prepare_sine_layer_params."""
    K, N = w_t.shape
    out_dtype = x.dtype if out_dtype is None else jnp.dtype(out_dtype)

    x2d = x.reshape(-1, K)              # collapse leading dims only; NO dtype cast here
    M = x2d.shape[0]

    vmem_cap = _vmem_capacity_bytes()
    tm = _pick_tm(
        M, K, N,
        jnp.dtype(x2d.dtype).itemsize,
        jnp.dtype(out_dtype).itemsize,
        jnp.dtype(compute_dtype).itemsize,
        vmem_budget=int(0.45 * vmem_cap),
        target=tm_target,
    )
    grid = (pl.cdiv(M, tm),)            # ragged last tile: OOB writes are dropped

    kernel = functools.partial(_sine_layer_kernel, compute_dtype=compute_dtype)

    out2d = pl.pallas_call(
        kernel,
        out_shape=jax.ShapeDtypeStruct((M, N), out_dtype),
        grid_spec=pltpu.PrefetchScalarGridSpec(
            num_scalar_prefetch=0,
            grid=grid,
            in_specs=[
                pl.BlockSpec((tm, K), lambda i: (i, 0)),
                pl.BlockSpec((K, N), lambda i: (0, 0)),   # resident weight
                pl.BlockSpec((1, N), lambda i: (0, 0)),   # resident bias
            ],
            out_specs=pl.BlockSpec((tm, N), lambda i: (i, 0)),
        ),
        compiler_params=pltpu.CompilerParams(
            dimension_semantics=("parallel",),
            vmem_limit_bytes=int(0.7 * vmem_cap),
        ),
    )(x2d, w_t, b2d)

    return out2d.reshape(*x.shape[:-1], N)


def sine_layer(x, weight, bias, omega_0=30.0, *, tm_target=1024,
               compute_dtype=jnp.bfloat16, out_dtype=None):
    """Convenience wrapper; for repeated calls hoist prepare_sine_layer_params."""
    w_t, b2d = prepare_sine_layer_params(weight, bias, omega_0, compute_dtype)
    return sine_layer_apply(x, w_t, b2d, tm_target=tm_target,
                            compute_dtype=compute_dtype, out_dtype=out_dtype)


def init_sine_layer_params(key, in_features, out_features, is_first=False, omega_0=30.0):
    """SIREN init, matching SineLayer.init_weights ranges."""
    kw, kb = jax.random.split(key)
    if is_first:
        bound = 1.0 / in_features
    else:
        bound = np.sqrt(6.0 / in_features) / omega_0
    weight = jax.random.uniform(
        kw, (out_features, in_features), minval=-bound, maxval=bound, dtype=jnp.float32)
    # nn.Linear default bias init: U(-1/sqrt(in_features), 1/sqrt(in_features))
    b_bound = 1.0 / np.sqrt(in_features)
    bias = jax.random.uniform(
        kb, (out_features,), minval=-b_bound, maxval=b_bound, dtype=jnp.float32)
    return weight, bias


if __name__ == "__main__":
    key = jax.random.PRNGKey(0)
    k_x, k_p = jax.random.split(key)

    batch, seq, in_features, out_features = 2, 8, 32, 32
    omega_0 = 30.0

    x = jax.random.normal(k_x, (batch, seq, in_features), dtype=jnp.float32)
    weight, bias = init_sine_layer_params(
        k_p, in_features, out_features, is_first=True, omega_0=omega_0)

    # One-time param transform, hoisted out of the hot path.
    w_t, b2d = prepare_sine_layer_params(weight, bias, omega_0)

    out = sine_layer_apply(x, w_t, b2d)
    out = jax.block_until_ready(out)
    assert out.shape == (batch, seq, out_features)
    assert out.dtype == x.dtype

    # Reference 1: same bf16 operands, f32 math -> validates kernel numerics tightly.
    xb = x.reshape(-1, in_features).astype(jnp.bfloat16).astype(jnp.float32)
    wb = w_t.astype(jnp.float32)
    ref_matched = jnp.sin(xb @ wb + b2d).reshape(batch, seq, out_features)
    np.testing.assert_allclose(np.asarray(out), np.asarray(ref_matched),
                               rtol=2e-3, atol=2e-3)

    # Reference 2: pure-f32 PyTorch-equivalent formula (loose check for bf16 operands).
    ref_np = np.sin(
        omega_0 * (np.asarray(x).reshape(-1, in_features) @ np.asarray(weight).T
                   + np.asarray(bias))).reshape(batch, seq, out_features)
    np.testing.assert_allclose(np.asarray(out), ref_np, rtol=0.1, atol=0.1)

    # Full-precision path (compute_dtype=f32) matches the PyTorch formula tightly.
    w_t32, b2d32 = prepare_sine_layer_params(weight, bias, omega_0,
                                             compute_dtype=jnp.float32)
    out_f32 = jax.block_until_ready(
        sine_layer_apply(x, w_t32, b2d32, compute_dtype=jnp.float32))
    np.testing.assert_allclose(np.asarray(out_f32), ref_np, rtol=1e-3, atol=1e-3)

    print("KERNEL_OK")
</pallas_src>

<mosaic_0001>
module attributes {stable_mosaic.version = 11 : i64} {
  func.func @_sine_layer_kernel(%arg0: i32, %arg1: memref<16x32xf32, #tpu.memory_space<vmem>>, %arg2: memref<32x32xbf16, #tpu.memory_space<vmem>>, %arg3: memref<1x32xf32, #tpu.memory_space<vmem>>, %arg4: memref<16x32xf32, #tpu.memory_space<vmem>>) attributes {dimension_semantics = [#tpu.dimension_semantics<parallel>], iteration_bounds = array<i64: 1>, scalar_prefetch = 0 : i64, scratch_operands = 0 : i64, tpu.core_type = #tpu.core_type<tc>, window_params = [{transform_indices = @transform_0, window_bounds = array<i64: 16, 32>}, {pipeline_mode = #tpu.pipeline_mode<synchronous>, transform_indices = @transform_1, window_bounds = array<i64: 32, 32>}, {pipeline_mode = #tpu.pipeline_mode<synchronous>, transform_indices = @transform_2, window_bounds = array<i64: 1, 32>}, {transform_indices = @transform_3, window_bounds = array<i64: 16, 32>}]} {
    %c0 = arith.constant 0 : index
    %c0_0 = arith.constant 0 : index
    %0 = vector.load %arg1[%c0, %c0_0] : memref<16x32xf32, #tpu.memory_space<vmem>>, vector<16x32xf32>
    %1 = arith.truncf %0 : vector<16x32xf32> to vector<16x32xbf16>
    %c0_1 = arith.constant 0 : index
    %c0_2 = arith.constant 0 : index
    %2 = vector.load %arg2[%c0_1, %c0_2] : memref<32x32xbf16, #tpu.memory_space<vmem>>, vector<32x32xbf16>
    %cst = arith.constant dense<0.000000e+00> : vector<16x32xf32>
    %3 = tpu.matmul %1, %2, %cst {dimension_numbers = #tpu.dot_dimension_numbers<[1], [0], [0], [1], [0, 0, 1, 1], [], []>} : vector<16x32xbf16>, vector<32x32xbf16>, vector<16x32xf32> -> vector<16x32xf32>
    %c0_3 = arith.constant 0 : index
    %c0_4 = arith.constant 0 : index
    %4 = vector.load %arg3[%c0_3, %c0_4] : memref<1x32xf32, #tpu.memory_space<vmem>>, vector<1x32xf32>
    %5 = vector.broadcast %4 : vector<1x32xf32> to vector<16x32xf32>
    %6 = arith.addf %3, %5 : vector<16x32xf32>
    %7 = math.sin %6 : vector<16x32xf32>
    %c0_5 = arith.constant 0 : index
    %c0_6 = arith.constant 0 : index
    %8 = vector.load %arg4[%c0_5, %c0_6] : memref<16x32xf32, #tpu.memory_space<vmem>>, vector<16x32xf32>
    tpu.vector_store %arg4[%c0_5, %c0_6], %7 {strides = array<i32>} : memref<16x32xf32, #tpu.memory_space<vmem>>, vector<16x32xf32>,
    return
  }
  func.func @transform_0(%arg0: i32) -> (i32, i32) {
    %c0_i32 = arith.constant 0 : i32
    %c0_i32_0 = arith.constant 0 : i32
    return %arg0, %c0_i32 : i32, i32
  }
  func.func @transform_1(%arg0: i32) -> (i32, i32) {
    %c0_i32 = arith.constant 0 : i32
    %c0_i32_0 = arith.constant 0 : i32
    %c0_i32_1 = arith.constant 0 : i32
    return %c0_i32, %c0_i32_0 : i32, i32
  }
  func.func @transform_2(%arg0: i32) -> (i32, i32) {
    %c0_i32 = arith.constant 0 : i32
    %c0_i32_0 = arith.constant 0 : i32
    %c0_i32_1 = arith.constant 0 : i32
    return %c0_i32, %c0_i32_0 : i32, i32
  }
  func.func @transform_3(%arg0: i32) -> (i32, i32) {
    %c0_i32 = arith.constant 0 : i32
    %c0_i32_0 = arith.constant 0 : i32
    return %arg0, %c0_i32 : i32, i32
  }
}

</mosaic_0001>

<bundles_post_ra>
// kernel: tpu_custom_call.1
= control target key start
LH: loop header
LB: loop body
LE: loop exit
PB: predicated region body
PF: predicated region fallthrough
CT: control target
= control target key end

     0   :  { %8 = vsyncpa [#allocation3], 0  ;;  %s623_s0 = inlined_call_operand.hbm [shape: f32[16,32], index: 0, kind: input, shape index: {}]   ;;  %s624_s1 = inlined_call_operand.hbm [shape: bf16[32,32], index: 1, kind: input, shape index: {}]   ;;  %s625_s2 = inlined_call_operand.vmem [shape: f32[1,32], index: 2, kind: input, shape index: {}]   ;;  %s626_s3 = inlined_call_operand.hbm [shape: f32[16,32], index: 3, kind: output, shape index: {}]  }
   0x1   :  { %9 = vsyncpa [#allocation6], 0 }
   0x2   :  { %10 = vsyncpa [#allocation4], 0  ;;  %s471_s12 = smov [#allocation2]   ;;  %s399_s16 = scalar_lea.hbm %s623_s0, 256 }
   0x3   :  { %s16_s13 = sshll.u32 %s471_s12, 4  ;;  %p400_p0 = scmp.ne.s32.totalorder %s623_s0, %s399_s16  ;;  %s17_s13 = int_to_ptr.vmem [resolvable:$true] %s16_s13 }
   0x4   :  { %p403_p1 = scmp.lt.u32.totalorder %s399_s16, %s623_s0 }
   0x6   :  { %p405_p2 = pnand %p403_p1, %p400_p0 }
   0x8   :  { %408 = shalt.err (!%p405_p2)
}
   0x9   :  { %s409_s21 = scalar_lea.vmem %s17_s13, 256  ;;  %p414_p4 = scmp.lt.s32.totalorder %s17_s13, %s17_s13 }
   0xa   :  { %p410_p3 = scmp.ne.s32.totalorder %s17_s13, %s409_s21  ;;  %p415_p5 = scmp.lt.s32.totalorder %s409_s21, %s409_s21 }
   0xc   :  { %p416_p6 = por %p415_p5, %p414_p4 }
   0xe   :  { %p417_p7 = pnand %p416_p6, %p410_p3 }
  0x10   :  { %420 = shalt.err (!%p417_p7)
}
  0x11   :  { %s472_s22 = smov 128   ;;  %s473_s23 = smov 8  }
  0x12   :  { %22 = dma.hbm_to_vmem [thread:$0]  %s623_s0, 256, %s17_s13, [#allocation3], %s472_s22, %s472_s22, %s473_s23  }
  0x13   :  { %s474_s26 = smov [#allocation5]   ;;  %s421_s30 = scalar_lea.hbm %s624_s1, 256 }
  0x14   :  { %s28_s27 = sshll.u32 %s474_s26, 4  ;;  %p422_p8 = scmp.ne.s32.totalorder %s624_s1, %s421_s30  ;;  %s29_s27 = int_to_ptr.vmem [resolvable:$true] %s28_s27 }
  0x15   :  { %p425_p9 = scmp.lt.u32.totalorder %s421_s30, %s624_s1 }
  0x17   :  { %p427_p10 = pnand %p425_p9, %p422_p8 }
  0x19   :  { %430 = shalt.err (!%p427_p10)
}
  0x1a   :  { %s431_s8 = scalar_lea.vmem %s29_s27, 256  ;;  %p436_p12 = scmp.lt.s32.totalorder %s29_s27, %s29_s27 }
  0x1b   :  { %p432_p11 = scmp.ne.s32.totalorder %s29_s27, %s431_s8  ;;  %p437_p13 = scmp.lt.s32.totalorder %s431_s8, %s431_s8 }
  0x1d   :  { %p438_p0 = por %p437_p13, %p436_p12 }
  0x1f   :  { %p439_p1 = pnand %p438_p0, %p432_p11 }
  0x21   :  { %442 = shalt.err (!%p439_p1)
}
  0x22   :  { %s475_s0 = smov 64   ;;  %s476_s9 = smov 4  }
  0x23   :  { %34 = dma.hbm_to_vmem [thread:$0]  %s624_s1, 256, %s29_s27, [#allocation6], %s475_s0, %s475_s0, %s476_s9  }
  0x24   :  { %465 = dma.done.wait [#allocation3], 256  }
  0x25   :  { %466 = vsyncadd [#allocation3], 4294967040 }
  0x26   :  { %467 = dma.done.wait [#allocation6], 256  }
  0x27   :  { %468 = vsyncadd [#allocation6], 4294967040  ;;  %v477_v0 = vmov 0.0   ;;  %vm478_vm0 = vmmov 0   ;;  %v389_v1 = vld [vmem:[#allocation5] sm:$0xff]   ;;  %v390_v2 = vld [vmem:[#allocation5 + $0x8] sm:$0xff]  }
  0x28   :  { %358 = vmatprep.subr.bf16.mxu0 %v477_v0  ;;  %362 = vmatprep.mubr.msk.bf16.mxu0 %vm478_vm0, %v477_v0  ;;  %v44_v3 = vld [vmem:[#allocation2] sm:$0xff]  ;;  %v45_v4 = vld [vmem:[#allocation2 + $0x8] sm:$0xff]  ;;  %vm70_vm1 = vcmask 261120   ;;  %v479_v31 = vmov 683565275  }
  0x29   :  { %359 = vmatpush3.bf16.msra.mxu0 %v389_v1  ;;  %v46_v5 = vpack.c.bf16 %v45_v4, %v44_v3  ;;  %v343_v6 = vld [vmem:[%s625_s2] ss:$0 sm:$0xff]  ;;  %v480_v34 = vmov 2475754826   ;;  %v481_v36 = vmov 2131351028  }
  0x2a   :  { %360 = vmatprep.subr.bf16.mxu0 %v477_v0  ;;  %v482_v38 = vmov 2102212464   ;;  %v483_v40 = vmov 920167782   ;;  %v484_v47 = vmov 1326507024  }
  0x2b   :  { %s485_s2 = smov [#allocation7]  }
  0x2c   :  { %s330_s13 = sshll.u32 %s485_s2, 4  ;;  %s331_s13 = int_to_ptr.vmem [resolvable:$true] %s330_s13 }
  0x2d   :  { %361 = vmatpush3.bf16.msra.mxu0 %v390_v2  ;;  %s443_s14 = scalar_lea.vmem %s331_s13, 256  ;;  %p448_p3 = scmp.lt.s32.totalorder %s331_s13, %s331_s13 }
  0x2e   :  { %p444_p2 = scmp.ne.s32.totalorder %s331_s13, %s443_s14  ;;  %p449_p4 = scmp.lt.s32.totalorder %s443_s14, %s443_s14 }
  0x30   :  { %363 = vmatmul.mubr.msk.bf16.vlgmr.msra.gmra.mrb[0].mxu0 %vm70_vm1, %v46_v5  ;;  %p450_p5 = por %p449_p4, %p448_p3 }
  0x32   :  { %p451_p6 = pnand %p450_p5, %p444_p2 }
 0x103   :  { %v108_v7 = vpop.f32.mrb[0].mxu0 }
 0x104   :  { %v537_v8 = vadd.f32 %v343_v6, %v108_v7  ;;  %v364_v9 = vpop.f32.mrb[1].mxu0 }
 0x105   :  { %v111_v10 = vpop.f32.mrb[2].mxu0 }
 0x106   :  { %v115_v11 = vand.u32 2147483647, %v537_v8  ;;  %v118_v12 = vand.u32 2139095040, %v537_v8  ;;  %v541_v13 = vadd.f32 %v343_v6, %v111_v10  ;;  %v365_v14 = vpop.f32.mrb[3].mxu0 }
 0x108   :  { %v119_v15 = vshrl.u32 %v118_v12, 23  ;;  %v122_v16 = vand.u32 8388607, %v115_v11  ;;  %v222_v17 = vand.u32 2139095040, %v541_v13  ;;  %v219_v19 = vand.u32 2147483647, %v541_v13 }
 0x109   :  { %vm116_vm0 = vcmp.le.f32.partialorder %v115_v11, 0.7853982 }
 0x10a   :  { %v347_v18 = vadd.s32 4294967169, %v119_v15  ;;  %v223_v20 = vshrl.u32 %v222_v17, 23  ;;  %v123_v22 = vor.u32 8388608, %v122_v16  ;;  %v226_v24 = vand.u32 8388607, %v219_v19 }
 0x10c   :  { %v125_v21 = vadd.s32 1, %v347_v18  ;;  %v351_v23 = vadd.s32 4294967169, %v223_v20  ;;  %v549_v29 = vshll.u32 %v123_v22, 8  ;;  %v227_v33 = vor.u32 8388608, %v226_v24 }
 0x10e   :  { %vm126_vm2 = vcmp.gt.s32.totalorder %v125_v21, 0  ;;  %v229_v26 = vadd.s32 1, %v351_v23  ;;  %v267_v2 = vshll.u32 %v227_v33, 8 }
 0x10f   :  { %v127_v25 = vsel %vm126_vm2, %v125_v21, 0  ;;  %vm117_vm2 = vcmp.lt.s32.totalorder %v537_v8, 0 }
 0x110   :  { %v128_v27 = vshrl.u32 %v127_v25, 5  ;;  %v129_v28 = vand.u32 31, %v127_v25  ;;  %vm230_vm3 = vcmp.gt.s32.totalorder %v229_v26, 0 }
 0x111   :  { %v231_v52 = vsel %vm230_vm3, %v229_v26, 0  ;;  %vm221_vm3 = vcmp.lt.s32.totalorder %v541_v13, 0 }
 0x112   :  { %v130_v30 = vsub.s32 32, %v129_v28  ;;  %v132_v32 = vshll.u32 %v479_v31, %v129_v28  ;;  %v135_v35 = vshll.u32 %v480_v34, %v129_v28  ;;  %v138_v37 = vshll.u32 %v481_v36, %v129_v28 }
 0x113   :  { %v141_v39 = vshll.u32 %v482_v38, %v129_v28  ;;  %v144_v41 = vshll.u32 %v483_v40, %v129_v28  ;;  %vm147_vm4 = vcmp.lt.s32.totalorder %v128_v27, 1  ;;  %vm149_vm5 = vcmp.lt.s32.totalorder %v128_v27, 3 }
 0x114   :  { %v133_v42 = vshrl.u32 %v480_v34, %v130_v30  ;;  %v136_v43 = vshrl.u32 %v481_v36, %v130_v30  ;;  %v139_v44 = vshrl.u32 %v482_v38, %v130_v30  ;;  %v131_v45 = vshrl.u32 %v479_v31, %v130_v30 }
 0x115   :  { %v142_v46 = vshrl.u32 %v483_v40, %v130_v30  ;;  %v145_v48 = vshrl.u32 %v484_v47, %v130_v30  ;;  %vm150_vm6 = vcmp.lt.s32.totalorder %v128_v27, 4  ;;  %v233_v55 = vand.u32 31, %v231_v52 }
 0x116   :  { %v134_v49 = vor.u32 %v133_v42, %v132_v32  ;;  %v137_v50 = vor.u32 %v136_v43, %v135_v35  ;;  %v140_v51 = vor.u32 %v139_v44, %v138_v37  ;;  %vm148_vm7 = vcmp.lt.s32.totalorder %v128_v27, 2 }
 0x117   :  { %v143_v53 = vor.u32 %v142_v46, %v141_v39  ;;  %v146_v54 = vor.u32 %v145_v48, %v144_v41  ;;  %v234_v63 = vsub.s32 32, %v233_v55  ;;  %v232_v6 = vshrl.u32 %v231_v52, 5 }
 0x118   :  { %v151_v56 = vsel %vm147_vm4, %v131_v45, %v134_v49  ;;  %v152_v57 = vsel %vm150_vm6, %v140_v51, 2102212464  ;;  %v155_v58 = vsel %vm147_vm4, %v134_v49, %v137_v50  ;;  %v159_v59 = vsel %vm147_vm4, %v137_v50, %v140_v51 }
 0x119   :  { %v153_v60 = vsel %vm149_vm5, %v137_v50, %v152_v57  ;;  %v156_v61 = vsel %vm150_vm6, %v143_v53, 920167782  ;;  %v160_v62 = vsel %vm150_vm6, %v146_v54, 1326507024  ;;  %v236_v14 = vshll.u32 %v479_v31, %v233_v55 }
 0x11a   :  { %v157_v0 = vsel %vm149_vm5, %v140_v51, %v156_v61  ;;  %v161_v1 = vsel %vm149_vm5, %v143_v53, %v160_v62  ;;  %v154_v3 = vsel %vm148_vm7, %v151_v56, %v153_v60  ;;  %v237_v15 = vshrl.u32 %v480_v34, %v234_v63 }
 0x11b   :  { %v158_v4 = vsel %vm148_vm7, %v155_v58, %v157_v0  ;;  %v162_v5 = vsel %vm148_vm7, %v159_v59, %v161_v1  ;;  %v239_v16 = vshll.u32 %v480_v34, %v233_v55  ;;  %v240_v17 = vshrl.u32 %v481_v36, %v234_v63 }
 0x11c   :  { %v561_v7 = vmul.u32.u64.low %v549_v29, %v162_v5  ;;  %v562_v9 = vmul.u32.u64.high %v549_v29, %v162_v5, %v561_v7  ;;  %v565_v10 = vmul.u32.u64.low %v549_v29, %v158_v4  ;;  %v566_v12 = vmul.u32.u64.high %v549_v29, %v158_v4, %v565_v10 }
 0x11d   :  { %v242_v18 = vshll.u32 %v481_v36, %v233_v55  ;;  %v243_v20 = vshrl.u32 %v482_v38, %v234_v63  ;;  %v245_v21 = vshll.u32 %v482_v38, %v233_v55  ;;  %v246_v22 = vshrl.u32 %v483_v40, %v234_v63 }
 0x11e   :  { %v238_v23 = vor.u32 %v237_v15, %v236_v14  ;;  %v241_v24 = vor.u32 %v240_v17, %v239_v16  ;;  %v248_v25 = vshll.u32 %v483_v40, %v233_v55  ;;  %v249_v26 = vshrl.u32 %v484_v47, %v234_v63 }
 0x11f   :  { %v170_v27 = vmul.u32 %v549_v29, %v154_v3  ;;  %vm172_vm8 = vc.u32 %v562_v9, %v565_v10  ;;  %v173_v28 = vadd.s32 1, %v566_v12  ;;  %v244_v30 = vor.u32 %v243_v20, %v242_v18 }
 0x120   :  { %v235_v32 = vshrl.u32 %v479_v31, %v234_v63  ;;  %v247_v33 = vor.u32 %v246_v22, %v245_v21  ;;  %v250_v34 = vor.u32 %v249_v26, %v248_v25  ;;  %vm251_vm9 = vcmp.lt.s32.totalorder %v232_v6, 1 }
 0x121   :  { %v174_v35 = vsel %vm172_vm8, %v173_v28, %v566_v12  ;;  %vm253_vm10 = vcmp.lt.s32.totalorder %v232_v6, 3  ;;  %vm254_vm11 = vcmp.lt.s32.totalorder %v232_v6, 4  ;;  %v259_v36 = vsel %vm251_vm9, %v238_v23, %v241_v24 }
 0x122   :  { %v175_v37 = vadd.s32 %v174_v35, %v170_v27  ;;  %v256_v38 = vsel %vm254_vm11, %v244_v30, 2102212464  ;;  %v260_v39 = vsel %vm254_vm11, %v247_v33, 920167782  ;;  %v263_v29 = vsel %vm251_vm9, %v241_v24, %v244_v30 }
 0x123   :  { %vm252_vm12 = vcmp.lt.s32.totalorder %v232_v6, 2  ;;  %v255_v40 = vsel %vm251_vm9, %v235_v32, %v238_v23  ;;  %v261_v41 = vsel %vm253_vm10, %v244_v30, %v260_v39  ;;  %v264_v42 = vsel %vm254_vm11, %v250_v34, 1326507024 }
 0x124   :  { %v176_v43 = vadd.s32 536870912, %v175_v37  ;;  %v257_v44 = vsel %vm253_vm10, %v241_v24, %v256_v38  ;;  %v262_v45 = vsel %vm252_vm12, %v259_v36, %v261_v41  ;;  %v265_v31 = vsel %vm253_vm10, %v247_v33, %v264_v42 }
 0x125   :  { %v266_v46 = vsel %vm252_vm12, %v263_v29, %v265_v31  ;;  %v576_v47 = vmul.u32.u64.low %v267_v2, %v262_v45  ;;  %v577_v48 = vmul.u32.u64.high %v267_v2, %v262_v45, %v576_v47  ;;  %v258_v52 = vsel %vm252_vm12, %v255_v40, %v257_v44 }
 0x126   :  { %v177_v49 = vshrl.u32 %v176_v43, 30  ;;  %v579_v50 = vmul.u32.u64.low %v267_v2, %v266_v46  ;;  %v580_v51 = vmul.u32.u64.high %v267_v2, %v266_v46, %v579_v50  ;;  %v274_v56 = vmul.u32 %v267_v2, %v258_v52 }
 0x127   :  { %v277_v54 = vadd.s32 1, %v577_v48  ;;  %v171_v5 = vadd.s32 %v565_v10, %v562_v9  ;;  %vm595_vm4 = vcmp.le.f32.partialorder %v219_v19, 0.7853982  ;;  %vm207_vm8 = vweird.f32 %v537_v8 }
 0x128   :  { %v178_v53 = vshll.u32 %v177_v49, 30  ;;  %vm276_vm13 = vc.u32 %v580_v51, %v576_v47  ;;  %v201_v26 = vsub.s32 4, %v177_v49  ;;  %v275_v9 = vadd.s32 %v576_v47, %v580_v51 }
 0x129   :  { %v278_v57 = vsel %vm276_vm13, %v277_v54, %v577_v48  ;;  %vm311_vm12 = vweird.f32 %v541_v13 }
 0x12a   :  { %v179_v55 = vsub.s32 %v175_v37, %v178_v53  ;;  %v279_v59 = vadd.s32 %v278_v57, %v274_v56  ;;  %v202_v38 = vsel %vm117_vm2, %v201_v26, %v177_v49 }
 0x12b   :  { %v204_v40 = vsel %vm116_vm0, 0, %v202_v38 }
 0x12c   :  { %v181_v58 = vsub.s32 0, %v179_v55  ;;  %v280_v61 = vadd.s32 536870912, %v279_v59  ;;  %v208_v44 = vadd.s32 3, %v204_v40 }
 0x12e   :  { %v348_v60 = vmin.u32 %v181_v58, %v179_v55  ;;  %v281_v63 = vshrl.u32 %v280_v61, 30  ;;  %v209_v47 = vand.u32 3, %v208_v44 }
 0x130   :  { %v183_v62 = vclz %v348_v60  ;;  %v282_v1 = vshll.u32 %v281_v63, 30  ;;  %v305_v45 = vsub.s32 4, %v281_v63  ;;  %vm214_vm5 = vcmp.eq.s32.totalorder %v209_v47, 2 }
 0x131   :  { %vm211_vm6 = vcmp.eq.s32.totalorder %v209_v47, 0  ;;  %vm210_vm7 = vcmp.lt.s32.totalorder %v209_v47, 2 }
 0x132   :  { %v349_v0 = vadd.s32 4294967294, %v183_v62  ;;  %v283_v3 = vsub.s32 %v279_v59, %v282_v1  ;;  %v306_v48 = vsel %vm221_vm3, %v305_v45, %v281_v63 }
 0x133   :  { %v308_v53 = vsel %vm595_vm4, 0, %v306_v48 }
 0x134   :  { %vm350_vm14 = vcmp.lt.s32.totalorder %v349_v0, 0  ;;  %v285_v7 = vsub.s32 0, %v283_v3  ;;  %v312_v56 = vadd.s32 3, %v308_v53 }
 0x135   :  { %v186_v4 = vsel %vm350_vm14, 0, %v349_v0 }
 0x136   :  { %v187_v6 = vsub.s32 32, %v186_v4  ;;  %v191_v2 = vsub.s32 4294967266, %v186_v4  ;;  %v188_v12 = vshll.u32 %v179_v55, %v186_v4  ;;  %v352_v16 = vmin.u32 %v285_v7, %v283_v3 }
 0x137   :  { %v313_v59 = vand.u32 3, %v312_v56 }
 0x138   :  { %v189_v14 = vshrl.u32 %v171_v5, %v187_v6  ;;  %v192_v15 = vadd.s32 127, %v191_v2  ;;  %v287_v20 = vclz %v352_v16 }
 0x139   :  { %vm318_vm9 = vcmp.eq.s32.totalorder %v313_v59, 2  ;;  %vm315_vm10 = vcmp.eq.s32.totalorder %v313_v59, 0  ;;  %vm314_vm11 = vcmp.lt.s32.totalorder %v313_v59, 2 }
 0x13a   :  { %v190_v17 = vor.u32 %v189_v14, %v188_v12  ;;  %v193_v18 = vshll.u32 %v192_v15, 23  ;;  %v353_v22 = vadd.s32 4294967294, %v287_v20 }
 0x13c   :  { %v194_v21 = vor.u32 4788187, %v193_v18  ;;  %v197_v24 = vcvt.s32.f32 %v190_v17  ;;  %vm354_vm15 = vcmp.lt.s32.totalorder %v353_v22, 0 }
 0x13d   :  { %v290_v25 = vsel %vm354_vm15, 0, %v353_v22 }
 0x13e   :  { %v195_v23 = vand.u32 2147483647, %v194_v21  ;;  %v291_v10 = vsub.s32 32, %v290_v25  ;;  %v295_v28 = vsub.s32 4294967266, %v290_v25  ;;  %v292_v32 = vshll.u32 %v283_v3, %v290_v25 }
 0x140   :  { %v198_v27 = vmul.f32 %v197_v24, %v195_v23  ;;  %v293_v33 = vshrl.u32 %v275_v9, %v291_v10  ;;  %v296_v34 = vadd.s32 127, %v295_v28 }
 0x142   :  { %v199_v30 = vxor.u32 2147483648, %v198_v27  ;;  %v294_v36 = vor.u32 %v293_v33, %v292_v32  ;;  %v297_v37 = vshll.u32 %v296_v34, 23 }
 0x144   :  { %v200_v35 = vsel %vm117_vm2, %v199_v30, %v198_v27  ;;  %v298_v29 = vor.u32 4788187, %v297_v37  ;;  %v301_v42 = vcvt.s32.f32 %v294_v36 }
 0x145   :  { %v203_v39 = vsel %vm116_vm0, %v537_v8, %v200_v35 }
 0x146   :  { %391 = vcosq.f32 %v203_v39  ;;  %v299_v41 = vand.u32 2147483647, %v298_v29 }
 0x147   :  { %393 = vsinq.f32 %v203_v39 }
 0x148   :  { %v302_v43 = vmul.f32 %v301_v42, %v299_v41 }
 0x14a   :  { %v303_v31 = vxor.u32 2147483648, %v302_v43 }
 0x14c   :  { %v304_v46 = vsel %vm221_vm3, %v303_v31, %v302_v43 }
 0x14d   :  { %v307_v49 = vsel %vm595_vm4, %v541_v13, %v304_v46 }
 0x14e   :  { %395 = vcosq.f32 %v307_v49 }
 0x14f   :  { %397 = vsinq.f32 %v307_v49 }
 0x150   :  { %v392_v50 = vpop.eup %391 }
 0x151   :  { %v394_v51 = vpop.eup %393  ;;  %v215_v52 = vxor.u32 2147483648, %v392_v50 }
 0x152   :  { %v212_v54 = vxor.u32 2147483648, %v394_v51 }
 0x153   :  { %v216_v19 = vsel %vm214_vm5, %v215_v52, %v394_v51 }
 0x154   :  { %v213_v55 = vsel %vm211_vm6, %v392_v50, %v212_v54 }
 0x155   :  { %v217_v57 = vsel %vm210_vm7, %v213_v55, %v216_v19 }
 0x156   :  { %v218_v58 = vsel %vm207_vm8, nan, %v217_v57 }
 0x157   :  { %323 = vst.msk [vmem:[#allocation7] sm:$0xff] %vm70_vm1, %v218_v58 }
 0x158   :  { %v396_v60 = vpop.eup %395 }
 0x159   :  { %v398_v61 = vpop.eup %397  ;;  %v319_v62 = vxor.u32 2147483648, %v396_v60 }
 0x15a   :  { %v316_v63 = vxor.u32 2147483648, %v398_v61 }
 0x15b   :  { %v320_v0 = vsel %vm318_vm9, %v319_v62, %v398_v61 }
 0x15c   :  { %v317_v1 = vsel %vm315_vm10, %v396_v60, %v316_v63 }
 0x15d   :  { %v321_v3 = vsel %vm314_vm11, %v317_v1, %v320_v0 }
 0x15e   :  { %v322_v8 = vsel %vm311_vm12, nan, %v321_v3 }
 0x15f   :  { %324 = vst.msk [vmem:[#allocation7 + $0x8] sm:$0xff] %vm70_vm1, %v322_v8 }
 0x160   :  { %454 = shalt.err (!%p451_p6)
}
 0x161   :  { %s455_s17 = scalar_lea.hbm %s626_s3, 256 }
 0x162   :  { %p456_p7 = scmp.ne.s32.totalorder %s626_s3, %s455_s17  ;;  %p459_p8 = scmp.lt.u32.totalorder %s455_s17, %s626_s3 }
 0x164   :  { %p461_p9 = pnand %p459_p8, %p456_p7 }
 0x166   :  { %464 = shalt.err (!%p461_p9)
}
 0x167   :  { %336 = dma.vmem_to_hbm [thread:$0]  %s331_s13, 256, %s626_s3, [#allocation4], %s472_s22, %s472_s22, %s473_s23  }
 0x168   :  { %469 = dma.done.wait [#allocation4], 256  }
 0x169   :  { %470 = vsyncadd [#allocation4], 4294967040 }
 0x16a   :  { %340 = vsyncpa [#allocation3], 1 }
 0x16b   :  { %341 = vsyncpa [#allocation6], 1 }
 0x16c   :  { %342 = vsyncpa [#allocation4], 1 }

</bundles_post_ra>
